<compile_context>
chip_gen: v7x
topology: tpu7x:2x2x1
jax: 0.10.0
libtpu: 0.0.40
codegen_flags: <defaults>
</compile_context>

<pallas_src>
import functools
import math

import jax
import jax.numpy as jnp
from jax.experimental import pallas as pl
from jax.experimental.pallas import tpu as pltpu

_MASK_VALUE = -1.0e30  # large finite negative: exp underflows to 0, no NaN risk


def _round_up(x, m):
    return ((x + m - 1) // m) * m


def _flash_sdpa_kernel(q_ref, k_ref, v_ref, o_ref,
                       qs_ref, m_ref, l_ref, acc_ref,
                       *, scale, kv_len, block_k, mask_kv, compute_dtype):
    ki = pl.program_id(2)
    last_ki = pl.num_programs(2) - 1

    @pl.when(ki == 0)
    def _init():
        # Scale + cast the q tile once per (b, q-tile); reused for every KV step.
        qs_ref[...] = (q_ref[0] * scale).astype(compute_dtype)
        m_ref[...] = jnp.full_like(m_ref, -jnp.inf)
        l_ref[...] = jnp.zeros_like(l_ref)
        acc_ref[...] = jnp.zeros_like(acc_ref)

    q = qs_ref[...]                                   # (block_q, d_k) compute_dtype
    k = k_ref[0].astype(compute_dtype)                # (block_k, d_k)
    v = v_ref[0].astype(compute_dtype)                # (block_k, d_v)

    # scores = Q @ K^T without materializing a transpose: contract last dims.
    s = jax.lax.dot_general(
        q, k,
        dimension_numbers=(((1,), (1,)), ((), ())),
        preferred_element_type=jnp.float32,
    )                                                 # (block_q, block_k) f32

    if mask_kv:
        # Only the final KV tile contains padded keys; mask only there so the
        # steady-state KV steps pay no iota/compare/select cost.
        def _mask_tail(x):
            col = jax.lax.broadcasted_iota(jnp.int32, x.shape, 1)
            return jnp.where(col < (kv_len - ki * block_k), x, _MASK_VALUE)

        s = jax.lax.cond(ki == last_ki, _mask_tail, lambda x: x, s)

    # Online (streaming) softmax update. m/l/acc stay f32.
    m_prev = m_ref[...]
    m_new = jnp.maximum(m_prev, jnp.max(s, axis=-1, keepdims=True))
    alpha = jnp.exp(m_prev - m_new)
    # exp on the compute dtype (bf16 EUP on v6e/v7x); sums/accumulation in f32.
    p = jnp.exp((s - m_new).astype(compute_dtype))
    l_ref[...] = alpha * l_ref[...] + jnp.sum(
        p.astype(jnp.float32), axis=-1, keepdims=True)
    acc_ref[...] = alpha * acc_ref[...] + jnp.dot(
        p, v, preferred_element_type=jnp.float32)
    m_ref[...] = m_new

    @pl.when(ki == last_ki)
    def _finalize():
        # Exact division: (block_q, 1) denominator once per q tile — free.
        o_ref[0] = (acc_ref[...] / l_ref[...]).astype(o_ref.dtype)


def scaled_dot_product_attention(q, k, v, *, block_q=512, block_k=512,
                                 compute_dtype=jnp.bfloat16):
    """q: (B, Lq, d_k), k: (B, Lk, d_k), v: (B, Lk, d_v) -> (B, Lq, d_v).

    compute_dtype: dtype for the MXU operands and the exp (accumulation is
    always f32). Default bf16 (standard flash-attention precision); pass
    jnp.float32 (or None for the input dtype) for a full-precision path.
    """
    B, Lq, d_k = q.shape
    Bk, Lk, d_k2 = k.shape
    Bv, Lk2, d_v = v.shape
    assert B == Bk == Bv and d_k == d_k2 and Lk == Lk2

    if compute_dtype is None:
        compute_dtype = q.dtype

    scale = 1.0 / math.sqrt(d_k)

    # Sublane-aligned sequence tiles; head dims kept at their native size
    # (BlockSpec last dim == full array dim is legal — no feature padding).
    block_q = min(block_q, _round_up(Lq, 8))
    block_k = min(block_k, _round_up(Lk, 8))
    Lqp = _round_up(Lq, block_q)
    Lkp = _round_up(Lk, block_k)

    def _pad_seq(x, L):
        pad_l = L - x.shape[1]
        if pad_l == 0:
            return x
        return jnp.pad(x, ((0, 0), (0, pad_l), (0, 0)))

    qp = _pad_seq(q, Lqp)
    kp = _pad_seq(k, Lkp)
    vp = _pad_seq(v, Lkp)

    mask_kv = Lkp != Lk   # only mask when the key axis actually got padded

    kernel = functools.partial(
        _flash_sdpa_kernel,
        scale=scale, kv_len=Lk, block_k=block_k, mask_kv=mask_kv,
        compute_dtype=compute_dtype)

    grid = (B, Lqp // block_q, Lkp // block_k)

    out = pl.pallas_call(
        kernel,
        out_shape=jax.ShapeDtypeStruct((B, Lqp, d_v), q.dtype),
        grid_spec=pltpu.PrefetchScalarGridSpec(
            num_scalar_prefetch=0,
            grid=grid,
            in_specs=[
                pl.BlockSpec((1, block_q, d_k), lambda b, qi, ki: (b, qi, 0)),
                pl.BlockSpec((1, block_k, d_k), lambda b, qi, ki: (b, ki, 0)),
                pl.BlockSpec((1, block_k, d_v), lambda b, qi, ki: (b, ki, 0)),
            ],
            out_specs=pl.BlockSpec((1, block_q, d_v),
                                   lambda b, qi, ki: (b, qi, 0)),
            scratch_shapes=[
                pltpu.VMEM((block_q, d_k), compute_dtype),  # scaled/cast q tile
                pltpu.VMEM((block_q, 1), jnp.float32),      # running max m
                pltpu.VMEM((block_q, 1), jnp.float32),      # running sum l
                pltpu.VMEM((block_q, d_v), jnp.float32),    # output accumulator
            ],
        ),
        compiler_params=pltpu.CompilerParams(
            # batch and query-tile axes parallel (megacore / v7x 2-TC split:
            # keep B * (Lq/block_q) >= 2 so both cores get work);
            # KV reduction axis must be arbitrary for the accumulator.
            dimension_semantics=("parallel", "parallel", "arbitrary"),
            # Default tiles use only a few MiB incl. double-buffering; 32 MiB
            # is safe on v5e/v6e (128 MiB) and v7x (64 MiB).
            vmem_limit_bytes=32 * 1024 * 1024,
        ),
    )(qp, kp, vp)

    if Lqp != Lq:
        out = out[:, :Lq, :]
    return out


def _reference(q, k, v):
    d_k = q.shape[-1]
    scores = jnp.einsum("bqd,bkd->bqk", q, k,
                        precision=jax.lax.Precision.HIGHEST)
    scores = scores / jnp.sqrt(jnp.float32(d_k))
    p = jax.nn.softmax(scores, axis=2)
    return jnp.einsum("bqk,bkd->bqd", p, v,
                      precision=jax.lax.Precision.HIGHEST)


if __name__ == "__main__":
    key = jax.random.PRNGKey(0)

    # Case 1: small shapes matching the module's typical use
    # (batch=2, seq=8, d_k=d_v=32). Single tile per (batch, q-tile).
    B, Lq, Lk, D_K, D_V = 2, 8, 8, 32, 32
    kq, kk, kv, k2 = jax.random.split(key, 4)
    q = jax.random.normal(kq, (B, Lq, D_K), dtype=jnp.float32)
    k = jax.random.normal(kk, (B, Lk, D_K), dtype=jnp.float32)
    v = jax.random.normal(kv, (B, Lk, D_V), dtype=jnp.float32)

    out = jax.block_until_ready(scaled_dot_product_attention(q, k, v))
    ref = _reference(q, k, v)
    assert out.shape == (B, Lq, D_V)
    # bf16 compute path: tolerance accounts for bf16 operands / bf16 exp.
    assert jnp.allclose(out, ref, atol=5e-2, rtol=5e-2), "case 1 mismatch"

    # Case 2: exercise multi-tile online softmax + ragged-key masking
    # (Lk=40 padded to 64 with block_k=32 -> 2 KV tiles, last one masked;
    #  Lq=24 padded to 32 with block_q=16 -> 2 q tiles).
    B2, Lq2, Lk2 = 2, 24, 40
    kq2, kk2, kv2 = jax.random.split(k2, 3)
    q2 = jax.random.normal(kq2, (B2, Lq2, D_K), dtype=jnp.float32)
    k2a = jax.random.normal(kk2, (B2, Lk2, D_K), dtype=jnp.float32)
    v2 = jax.random.normal(kv2, (B2, Lk2, D_V), dtype=jnp.float32)

    out2 = jax.block_until_ready(
        scaled_dot_product_attention(q2, k2a, v2, block_q=16, block_k=32))
    ref2 = _reference(q2, k2a, v2)
    assert out2.shape == (B2, Lq2, D_V)
    assert jnp.allclose(out2, ref2, atol=5e-2, rtol=5e-2), "case 2 mismatch"

    # Case 3: same shapes, full-precision compute path (f32 operands) to
    # validate the online-softmax algorithm independently of bf16 rounding.
    out3 = jax.block_until_ready(
        scaled_dot_product_attention(q2, k2a, v2, block_q=16, block_k=32,
                                     compute_dtype=jnp.float32))
    assert jnp.allclose(out3, ref2, atol=2e-3, rtol=2e-3), "case 3 mismatch"

    print("KERNEL_OK")
</pallas_src>

<mosaic_0001>
module attributes {stable_mosaic.version = 11 : i64} {
  func.func @_flash_sdpa_kernel(%arg0: i32, %arg1: i32, %arg2: i32, %arg3: memref<1x8x32xf32, #tpu.memory_space<vmem>>, %arg4: memref<1x8x32xf32, #tpu.memory_space<vmem>>, %arg5: memref<1x8x32xf32, #tpu.memory_space<vmem>>, %arg6: memref<1x8x32xf32, #tpu.memory_space<vmem>>, %arg7: memref<8x32xbf16, #tpu.memory_space<vmem>>, %arg8: memref<8x1xf32, #tpu.memory_space<vmem>>, %arg9: memref<8x1xf32, #tpu.memory_space<vmem>>, %arg10: memref<8x32xf32, #tpu.memory_space<vmem>>) attributes {dimension_semantics = [#tpu.dimension_semantics<parallel>, #tpu.dimension_semantics<parallel>, #tpu.dimension_semantics<arbitrary>], iteration_bounds = array<i64: 2, 1, 1>, scalar_prefetch = 0 : i64, scratch_operands = 4 : i64, tpu.core_type = #tpu.core_type<tc>, window_params = [{transform_indices = @transform_0, window_bounds = array<i64: 1, 8, 32>}, {transform_indices = @transform_1, window_bounds = array<i64: 1, 8, 32>}, {transform_indices = @transform_2, window_bounds = array<i64: 1, 8, 32>}, {transform_indices = @transform_3, window_bounds = array<i64: 1, 8, 32>}]} {
    %c0_i32 = arith.constant 0 : i32
    %0 = arith.cmpi eq, %arg2, %c0_i32 : i32
    %1 = arith.extui %0 : i1 to i32
    %c0_i32_0 = arith.constant 0 : i32
    %2 = arith.cmpi ne, %1, %c0_i32_0 : i32
    scf.if %2 {
      %c0_25 = arith.constant 0 : index
      %c0_26 = arith.constant 0 : index
      %c0_27 = arith.constant 0 : index
      %38 = vector.load %arg3[%c0_25, %c0_26, %c0_27] : memref<1x8x32xf32, #tpu.memory_space<vmem>>, vector<1x8x32xf32>
      %39 = vector.shape_cast %38 : vector<1x8x32xf32> to vector<8x32xf32>
      %cst_28 = arith.constant 0.176776692 : f32
      %40 = vector.broadcast %cst_28 : f32 to vector<8x32xf32>
      %41 = arith.mulf %39, %40 : vector<8x32xf32>
      %42 = arith.truncf %41 : vector<8x32xf32> to vector<8x32xbf16>
      %c0_29 = arith.constant 0 : index
      %c0_30 = arith.constant 0 : index
      %43 = vector.load %arg7[%c0_29, %c0_30] : memref<8x32xbf16, #tpu.memory_space<vmem>>, vector<8x32xbf16>
      tpu.vector_store %arg7[%c0_29, %c0_30], %42 {strides = array<i32>} : memref<8x32xbf16, #tpu.memory_space<vmem>>, vector<8x32xbf16>,
      %cst_31 = arith.constant 0xFF800000 : f32
      %44 = vector.broadcast %cst_31 : f32 to vector<8x1xf32>
      %c0_32 = arith.constant 0 : index
      %c0_33 = arith.constant 0 : index
      %45 = vector.load %arg8[%c0_32, %c0_33] : memref<8x1xf32, #tpu.memory_space<vmem>>, vector<8x1xf32>
      tpu.vector_store %arg8[%c0_32, %c0_33], %44 {strides = array<i32>} : memref<8x1xf32, #tpu.memory_space<vmem>>, vector<8x1xf32>,
      %cst_34 = arith.constant 0.000000e+00 : f32
      %46 = vector.broadcast %cst_34 : f32 to vector<8x1xf32>
      %c0_35 = arith.constant 0 : index
      %c0_36 = arith.constant 0 : index
      %47 = vector.load %arg9[%c0_35, %c0_36] : memref<8x1xf32, #tpu.memory_space<vmem>>, vector<8x1xf32>
      tpu.vector_store %arg9[%c0_35, %c0_36], %46 {strides = array<i32>} : memref<8x1xf32, #tpu.memory_space<vmem>>, vector<8x1xf32>,
      %cst_37 = arith.constant 0.000000e+00 : f32
      %48 = vector.broadcast %cst_37 : f32 to vector<8x32xf32>
      %c0_38 = arith.constant 0 : index
      %c0_39 = arith.constant 0 : index
      %49 = vector.load %arg10[%c0_38, %c0_39] : memref<8x32xf32, #tpu.memory_space<vmem>>, vector<8x32xf32>
      tpu.vector_store %arg10[%c0_38, %c0_39], %48 {strides = array<i32>} : memref<8x32xf32, #tpu.memory_space<vmem>>, vector<8x32xf32>,
    } else {
    }
    %c0 = arith.constant 0 : index
    %c0_1 = arith.constant 0 : index
    %3 = vector.load %arg7[%c0, %c0_1] : memref<8x32xbf16, #tpu.memory_space<vmem>>, vector<8x32xbf16>
    %c0_2 = arith.constant 0 : index
    %c0_3 = arith.constant 0 : index
    %c0_4 = arith.constant 0 : index
    %4 = vector.load %arg4[%c0_2, %c0_3, %c0_4] : memref<1x8x32xf32, #tpu.memory_space<vmem>>, vector<1x8x32xf32>
    %5 = vector.shape_cast %4 : vector<1x8x32xf32> to vector<8x32xf32>
    %6 = arith.truncf %5 : vector<8x32xf32> to vector<8x32xbf16>
    %c0_5 = arith.constant 0 : index
    %c0_6 = arith.constant 0 : index
    %c0_7 = arith.constant 0 : index
    %7 = vector.load %arg5[%c0_5, %c0_6, %c0_7] : memref<1x8x32xf32, #tpu.memory_space<vmem>>, vector<1x8x32xf32>
    %8 = vector.shape_cast %7 : vector<1x8x32xf32> to vector<8x32xf32>
    %9 = arith.truncf %8 : vector<8x32xf32> to vector<8x32xbf16>
    %cst = arith.constant dense<0.000000e+00> : vector<8x8xf32>
    %10 = tpu.matmul %3, %6, %cst {dimension_numbers = #tpu.dot_dimension_numbers<[1], [1], [0], [0], [0, 0, 1, 0], [], []>} : vector<8x32xbf16>, vector<8x32xbf16>, vector<8x8xf32> -> vector<8x8xf32>
    %c0_8 = arith.constant 0 : index
    %c0_9 = arith.constant 0 : index
    %11 = vector.load %arg8[%c0_8, %c0_9] : memref<8x1xf32, #tpu.memory_space<vmem>>, vector<8x1xf32>
    %cst_10 = arith.constant dense<0xFF800000> : vector<8xf32>
    %12 = vector.multi_reduction <maximumf>, %10, %cst_10 [1] : vector<8x8xf32> to vector<8xf32>
    %13 = vector.shape_cast %12 : vector<8xf32> to vector<8x1xf32>
    %14 = arith.maximumf %11, %13 : vector<8x1xf32>
    %15 = arith.subf %11, %14 : vector<8x1xf32>
    %16 = math.exp %15 : vector<8x1xf32>
    %17 = vector.broadcast %14 : vector<8x1xf32> to vector<8x8xf32>
    %18 = arith.subf %10, %17 : vector<8x8xf32>
    %19 = arith.truncf %18 : vector<8x8xf32> to vector<8x8xbf16>
    %20 = math.exp %19 : vector<8x8xbf16>
    %c0_11 = arith.constant 0 : index
    %c0_12 = arith.constant 0 : index
    %21 = vector.load %arg9[%c0_11, %c0_12] : memref<8x1xf32, #tpu.memory_space<vmem>>, vector<8x1xf32>
    %22 = arith.mulf %16, %21 : vector<8x1xf32>
    %23 = arith.extf %20 : vector<8x8xbf16> to vector<8x8xf32>
    %cst_13 = arith.constant dense<0.000000e+00> : vector<8xf32>
    %24 = vector.multi_reduction <add>, %23, %cst_13 [1] : vector<8x8xf32> to vector<8xf32>
    %25 = vector.shape_cast %24 : vector<8xf32> to vector<8x1xf32>
    %26 = arith.addf %22, %25 : vector<8x1xf32>
    %c0_14 = arith.constant 0 : index
    %c0_15 = arith.constant 0 : index
    %27 = vector.load %arg9[%c0_14, %c0_15] : memref<8x1xf32, #tpu.memory_space<vmem>>, vector<8x1xf32>
    tpu.vector_store %arg9[%c0_14, %c0_15], %26 {strides = array<i32>} : memref<8x1xf32, #tpu.memory_space<vmem>>, vector<8x1xf32>,
    %c0_16 = arith.constant 0 : index
    %c0_17 = arith.constant 0 : index
    %28 = vector.load %arg10[%c0_16, %c0_17] : memref<8x32xf32, #tpu.memory_space<vmem>>, vector<8x32xf32>
    %29 = vector.broadcast %16 : vector<8x1xf32> to vector<8x32xf32>
    %30 = arith.mulf %29, %28 : vector<8x32xf32>
    %cst_18 = arith.constant dense<0.000000e+00> : vector<8x32xf32>
    %31 = tpu.matmul %20, %9, %cst_18 {dimension_numbers = #tpu.dot_dimension_numbers<[1], [0], [0], [1], [0, 0, 1, 1], [], []>} : vector<8x8xbf16>, vector<8x32xbf16>, vector<8x32xf32> -> vector<8x32xf32>
    %32 = arith.addf %30, %31 : vector<8x32xf32>
    %c0_19 = arith.constant 0 : index
    %c0_20 = arith.constant 0 : index
    %33 = vector.load %arg10[%c0_19, %c0_20] : memref<8x32xf32, #tpu.memory_space<vmem>>, vector<8x32xf32>
    tpu.vector_store %arg10[%c0_19, %c0_20], %32 {strides = array<i32>} : memref<8x32xf32, #tpu.memory_space<vmem>>, vector<8x32xf32>,
    %c0_21 = arith.constant 0 : index
    %c0_22 = arith.constant 0 : index
    %34 = vector.load %arg8[%c0_21, %c0_22] : memref<8x1xf32, #tpu.memory_space<vmem>>, vector<8x1xf32>
    tpu.vector_store %arg8[%c0_21, %c0_22], %14 {strides = array<i32>} : memref<8x1xf32, #tpu.memory_space<vmem>>, vector<8x1xf32>,
    %c0_i32_23 = arith.constant 0 : i32
    %35 = arith.cmpi eq, %arg2, %c0_i32_23 : i32
    %36 = arith.extui %35 : i1 to i32
    %c0_i32_24 = arith.constant 0 : i32
    %37 = arith.cmpi ne, %36, %c0_i32_24 : i32
    scf.if %37 {
      %c0_25 = arith.constant 0 : index
      %c0_26 = arith.constant 0 : index
      %38 = vector.load %arg10[%c0_25, %c0_26] : memref<8x32xf32, #tpu.memory_space<vmem>>, vector<8x32xf32>
      %c0_27 = arith.constant 0 : index
      %c0_28 = arith.constant 0 : index
      %39 = vector.load %arg9[%c0_27, %c0_28] : memref<8x1xf32, #tpu.memory_space<vmem>>, vector<8x1xf32>
      %40 = vector.broadcast %39 : vector<8x1xf32> to vector<8x32xf32>
      %41 = arith.divf %38, %40 : vector<8x32xf32>
      %c0_29 = arith.constant 0 : index
      %c0_30 = arith.constant 0 : index
      %c0_31 = arith.constant 0 : index
      %42 = vector.load %arg6[%c0_29, %c0_30, %c0_31] : memref<1x8x32xf32, #tpu.memory_space<vmem>>, vector<1x8x32xf32>
      %43 = vector.shape_cast %42 : vector<1x8x32xf32> to vector<8x32xf32>
      %44 = vector.shape_cast %41 : vector<8x32xf32> to vector<1x8x32xf32>
      tpu.vector_store %arg6[%c0_29, %c0_30, %c0_31], %44 {strides = array<i32>} : memref<1x8x32xf32, #tpu.memory_space<vmem>>, vector<1x8x32xf32>,
    } else {
    }
    return
  }
  func.func @transform_0(%arg0: i32, %arg1: i32, %arg2: i32) -> (i32, i32, i32) {
    %c0_i32 = arith.constant 0 : i32
    %c0_i32_0 = arith.constant 0 : i32
    return %arg0, %arg1, %c0_i32 : i32, i32, i32
  }
  func.func @transform_1(%arg0: i32, %arg1: i32, %arg2: i32) -> (i32, i32, i32) {
    %c0_i32 = arith.constant 0 : i32
    %c0_i32_0 = arith.constant 0 : i32
    return %arg0, %arg2, %c0_i32 : i32, i32, i32
  }
  func.func @transform_2(%arg0: i32, %arg1: i32, %arg2: i32) -> (i32, i32, i32) {
    %c0_i32 = arith.constant 0 : i32
    %c0_i32_0 = arith.constant 0 : i32
    return %arg0, %arg2, %c0_i32 : i32, i32, i32
  }
  func.func @transform_3(%arg0: i32, %arg1: i32, %arg2: i32) -> (i32, i32, i32) {
    %c0_i32 = arith.constant 0 : i32
    %c0_i32_0 = arith.constant 0 : i32
    return %arg0, %arg1, %c0_i32 : i32, i32, i32
  }
}

</mosaic_0001>

<bundles_post_ra>
// kernel: tpu_custom_call.1
= control target key start
LH: loop header
LB: loop body
LE: loop exit
PB: predicated region body
PF: predicated region fallthrough
CT: control target
= control target key end

     0   :  { %s1198_s0 = inlined_call_operand.hbm [shape: f32[2,8,32], index: 0, kind: input, shape index: {}]   ;;  %s1199_s1 = inlined_call_operand.hbm [shape: f32[2,8,32], index: 1, kind: input, shape index: {}]   ;;  %s1200_s2 = inlined_call_operand.hbm [shape: f32[2,8,32], index: 2, kind: input, shape index: {}]   ;;  %s1201_s3 = inlined_call_operand.hbm [shape: f32[2,8,32], index: 3, kind: output, shape index: {}]  }
   0x1   :  { %1207 = sst [smem:[#allocation19_spill]] %s1199_s1 }
   0x2   :  { %8 = vsyncpa [#allocation7], 0 }
   0x3   :  { %10 = vsyncpa [#allocation7 + $0x1], 0 }
   0x4   :  { %11 = vsyncpa [#allocation10], 0 }
   0x5   :  { %13 = vsyncpa [#allocation10 + $0x1], 0 }
   0x6   :  { %14 = vsyncpa [#allocation8], 0 }
   0x7   :  { %16 = vsyncpa [#allocation8 + $0x1], 0  ;;  %s922_s12 = smov 0   ;;  %s924_s13 = smov 0  }
   0x8   :  { %s926_s14 = smov 0   ;;  %s928_s15 = smov 0  }
   0x9   :  { %s930_s16 = smov 0   ;;  %s932_s17 = smov 0  }
   0xa LB: > { %1208 = sst [smem:[#allocation16_spill]] %s888_s16  ;;  %s953_s18 = sadd.s32 4294967295, %s892_s17   ;;  %s892_s17 = sphi %s932_s17, %s22_s17   ;;  %s888_s16 = sphi %s930_s16, %s1229_s16   ;;  %s884_s15 = sphi %s928_s15, %s1228_s15   ;;  %s880_s14 = sphi %s926_s14, %s1232_s14   ;;  %s876_s13 = sphi %s924_s13, %s1231_s13   ;;  %s872_s12 = sphi %s922_s12, %s1230_s12  }
   0xb   : > { %s596_s19 = sadd.s32 4294967294, %s892_s17   ;;  %s41_s20 = sadd.s32 1, %s888_s16 }
   0xc   : > { %s50_s21 = sadd.s32 1, %s880_s14  ;;  %p43_p0 = scmp.ge.s32.totalorder %s41_s20, 2 }
   0xd   : > { %p57_p1 = scmp.ne.s32.totalorder %s880_s14, %s876_s13  ;;  %p58_p2 = scmp.eq.s32.totalorder %s892_s17, 0 }
   0xe   : > { %p63_p3 = scmp.ne.s32.totalorder %s876_s13, %s872_s12  ;;  %s1234_s20 = smov (%p43_p0, %s41_s20), 0 }
   0xf   : > { %1209 = sst [smem:[#allocation17_spill]] %s1234_s20  ;;  %p965_p4 = por %p58_p2, %p57_p1 }
  0x10   : > { %p64_p5 = scmp.eq.s32.totalorder %s953_s18, 0  ;;  %s45_s23 = ssub.s32 %s888_s16, %s1234_s20 }
  0x11   : > { %p145_p6 = scmp.eq.s32.totalorder %s953_s18, 1  ;;  %p48_p7 = scmp.eq.s32.totalorder %s45_s23, 0 }
  0x12   : > { %p973_p8 = por %p64_p5, %p63_p3  ;;  %p151_p10 = scmp.eq.s32.totalorder %s596_s19, 1 }
  0x13   : > { %p977_p9 = por %p145_p6, %p57_p1  ;;  %p654_p13 = scmp.lt.s32.totalorder %s892_s17, 2 }
  0x14   : > { %s1211_s24 = scalar_select %p973_p8, 1, 0 }
  0x15   : > { %s1212_s25 = scalar_select %p977_p9, 1, 0 }
  0x16   : > { %s982_s26 = scalar_select %p48_p7, %s880_s14, %s50_s21  }
  0x17   : > { %p984_p11 = por %p151_p10, %p63_p3  ;;  %s171_s28 = sand.u32 1, %s880_s14  }
  0x18   : > { %1213 = sst [smem:[#allocation18_spill]] %s982_s26  ;;  %s993_s29 = sshll.u32 %s171_s28, 3 }
  0x19   : > { %s1214_s27 = scalar_select %p984_p11, 1, 0 }
  0x1a   : > { %s996_s30 = sshll.u32 %s888_s16, 7  ;;  %p1000_p0 = pnand %p654_p13, %p965_p4 }
  0x1b   : > { %s190_s5 = sand.u32 1, %s892_s17   ;;  %s1216_s1 = sld [smem:[#allocation19_spill]] }
  0x1c   : > { %s1215_s4 = scalar_select %p1000_p0, 1, 0 }
  0x1d   : > { %s194_s9 = scalar_lea.vmem [#allocation9], %s993_s29  ;;  %s1016_s11 = scalar_lea.sflag [#allocation10], %s190_s5 }
  0x1e   : > { %s202_s10 = sshll.u32 %s194_s9, 4  ;;  %p1022_p4 = pneg %p1000_p0  ;;  %s1013_s10 = int_to_ptr.vmem [resolvable:$true] %s202_s10 }
  0x21   : > { %s1009_s8 = scalar_lea.hbm %s1216_s1, %s996_s30  ;;  %s721_s6 = scalar_lea.hbm %s1216_s1, 256 }
  0x22   : > { %s716_s19 = scalar_lea.hbm %s1009_s8, 128  ;;  %p722_p7 = scmp.lt.u32.totalorder %s1009_s8, %s1216_s1 }
  0x23   : > { %p717_p3 = scmp.ne.s32.totalorder %s1009_s8, %s716_s19  ;;  %p723_p10 = scmp.lt.u32.totalorder %s721_s6, %s716_s19 }
  0x24   : > { %p725_p12 = scmp.lt.u32.totalorder %s716_s19, %s1009_s8 }
  0x25   : > { %p719_p5 = pnand %p1022_p4, %p717_p3  ;;  %p724_p13 = por %p723_p10, %p722_p7 }
  0x27   : > { %p720_p6 = pneg %p719_p5  ;;  %p726_p1 = por %p725_p12, %p724_p13 }
  0x29   : > { %p727_p2 = pnand %p726_p1, %p720_p6 }
  0x2b   : > { %730 = shalt.err (!%p727_p2)
}
  0x2c   : > { %s731_s5 = scalar_lea.vmem %s1013_s10, 128  ;;  %s894_s22 = smov [#allocation9]  }
  0x2d   : > { %p732_p3 = scmp.ne.s32.totalorder %s1013_s10, %s731_s5  ;;  %s736_s23 = sshll.u32 %s894_s22, 4  ;;  %s737_s23 = int_to_ptr.vmem [resolvable:$false] %s736_s23 }
  0x2e   : > { %s738_s7 = scalar_lea.vmem %s737_s23, 256  ;;  %p739_p9 = scmp.lt.s32.totalorder %s1013_s10, %s737_s23 }
  0x2f   : > { %p734_p5 = pnand %p732_p3, %p1022_p4  ;;  %p740_p8 = scmp.lt.s32.totalorder %s738_s7, %s731_s5 }
  0x31   : > { %p735_p11 = pneg %p734_p5  ;;  %p741_p7 = por %p740_p8, %p739_p9 }
  0x33   : > { %p742_p10 = pnand %p741_p7, %p735_p11 }
  0x35   : > { %745 = shalt.err (!%p742_p10)
}
  0x36   : > { %646 = dma.hbm_to_vmem [thread:$0]  (!%p1000_p0), %s1009_s8, 128, %s1013_s10, %s1016_s11  }
  0x37   : > { %p1218_p12 = scmp.lt.s32.totalorder %s892_s17, 3  ;;  %p1219_p1 = scmp.ge.s32.totalorder %s892_s17, 1 }
  0x38   : > { %s1058_s5 = scalar_lea.hbm %s1198_s0, %s996_s30  ;;  %s175_s22 = scalar_lea.vmem [#allocation6], %s993_s29 }
  0x39   : > { %p1050_p2 = pnand %p1219_p1, %p1218_p12  ;;  %s183_s23 = sshll.u32 %s175_s22, 4  ;;  %s1061_s23 = int_to_ptr.vmem [resolvable:$true] %s183_s23 }
  0x3a   : > { %s1067_s7 = scalar_lea.hbm %s1200_s2, %s996_s30  ;;  %s172_s1 = scalar_lea.sflag [#allocation7], %s171_s28 }
  0x3b   : > { %s1220_s19 = scalar_select %p1050_p2, 1, 0 }
  0x3c   : > { %s746_s20 = scalar_lea.hbm %s1058_s5, 128  ;;  %s751_s16 = scalar_lea.hbm %s1198_s0, 256 }
  0x3d   : > { %p747_p8 = scmp.ne.s32.totalorder %s1058_s5, %s746_s20  ;;  %p752_p6 = scmp.lt.u32.totalorder %s1058_s5, %s1198_s0 }
  0x3e   : > { %p753_p13 = scmp.lt.u32.totalorder %s751_s16, %s746_s20  ;;  %p755_p5 = scmp.lt.u32.totalorder %s746_s20, %s1058_s5 }
  0x3f   : > { %p749_p9 = pnand %p747_p8, %p1022_p4 }
  0x40   : > { %p754_p3 = por %p753_p13, %p752_p6 }
  0x41   : > { %p750_p11 = pneg %p749_p9 }
  0x42   : > { %p756_p7 = por %p755_p5, %p754_p3 }
  0x44   : > { %p757_p10 = pnand %p756_p7, %p750_p11 }
  0x46   : > { %760 = shalt.err (!%p757_p10)
}
  0x47   : > { %s761_s28 = scalar_lea.vmem %s1061_s23, 128  ;;  %s895_s30 = smov [#allocation6]  }
  0x48   : > { %p762_p12 = scmp.ne.s32.totalorder %s1061_s23, %s761_s28  ;;  %s766_s8 = sshll.u32 %s895_s30, 4  ;;  %s767_s8 = int_to_ptr.vmem [resolvable:$false] %s766_s8 }
  0x49   : > { %s768_s26 = scalar_lea.vmem %s767_s8, 256  ;;  %p769_p9 = scmp.lt.s32.totalorder %s1061_s23, %s767_s8 }
  0x4a   : > { %p764_p1 = pnand %p762_p12, %p1022_p4  ;;  %p770_p2 = scmp.lt.s32.totalorder %s768_s26, %s761_s28 }
  0x4c   : > { %p765_p8 = pneg %p764_p1  ;;  %p771_p6 = por %p770_p2, %p769_p9 }
  0x4e   : > { %p772_p13 = pnand %p771_p6, %p765_p8 }
  0x50   : > { %775 = shalt.err (!%p772_p13)
}
  0x51   : > { %643 = dma.hbm_to_vmem [thread:$0]  (!%p1000_p0), %s1058_s5, 128, %s1061_s23, %s172_s1  }
  0x52   : > { %s213_s16 = scalar_lea.vmem [#allocation11], %s993_s29  ;;  %s776_s10 = scalar_lea.hbm %s1067_s7, 128 }
  0x53   : > { %s221_s20 = sshll.u32 %s213_s16, 4  ;;  %p777_p11 = scmp.ne.s32.totalorder %s1067_s7, %s776_s10  ;;  %s222_s20 = int_to_ptr.vmem [resolvable:$true] %s221_s20 }
  0x54   : > { %s781_s22 = scalar_lea.hbm %s1200_s2, 256  ;;  %p782_p5 = scmp.lt.u32.totalorder %s1067_s7, %s1200_s2 }
  0x55   : > { %p779_p2 = pnand %p777_p11, %p1022_p4  ;;  %p783_p7 = scmp.lt.u32.totalorder %s781_s22, %s776_s10 }
  0x56   : > { %p785_p12 = scmp.lt.u32.totalorder %s776_s10, %s1067_s7 }
  0x57   : > { %p780_p3 = pneg %p779_p2  ;;  %p784_p10 = por %p783_p7, %p782_p5 }
  0x59   : > { %p786_p1 = por %p785_p12, %p784_p10 }
  0x5b   : > { %p787_p8 = pnand %p786_p1, %p780_p3 }
  0x5d   : > { %790 = shalt.err (!%p787_p8)
}
  0x5e   : > { %s791_s1 = scalar_lea.vmem %s222_s20, 128  ;;  %s896_s29 = smov [#allocation11]  }
  0x5f   : > { %p792_p9 = scmp.ne.s32.totalorder %s222_s20, %s791_s1  ;;  %s796_s5 = sshll.u32 %s896_s29, 4  ;;  %s797_s5 = int_to_ptr.vmem [resolvable:$false] %s796_s5 }
  0x60   : > { %s798_s23 = scalar_lea.vmem %s797_s5, 256  ;;  %p799_p11 = scmp.lt.s32.totalorder %s222_s20, %s797_s5 }
  0x61   : > { %p794_p6 = pnand %p792_p9, %p1022_p4  ;;  %p800_p2 = scmp.lt.s32.totalorder %s798_s23, %s791_s1 }
  0x63   : > { %p795_p13 = pneg %p794_p6  ;;  %p801_p0 = por %p800_p2, %p799_p11 }
  0x65   : > { %p802_p5 = pnand %p801_p0, %p795_p13 }
  0x67   : > { %805 = shalt.err (!%p802_p5)
}
  0x68   : > { %p1221_p7 = scmp.ne.s32.totalorder %s1215_s4, 0  ;;  %p1222_p3 = scmp.ne.s32.totalorder %s1220_s19, 0 }
  0x69   : > { %s1114_s21 = sand.u32 (!%p1222_p3), 1, %s876_s13   ;;  %p1223_p0 = scmp.ne.s32.totalorder (!%p1222_p3), %s1211_s24, 0 }
  0x6a   : > { %649 = dma.hbm_to_vmem [thread:$0]  (!%p1221_p7), %s1067_s7, 128, %s222_s20, %s1016_s11  }
  0x6b   : > { %230 = sbr.rel (%p1222_p3) target bundleno = 944 (0x3b0), region = 32  ;;  %s1117_s8 = sshll.u32 (!%p1222_p3), %s1114_s21, 3 }
  0x6c   : > { %s233_s26 = scalar_lea.sflag (!%p1222_p3), [#allocation7], %s1114_s21  ;;  %s236_s16 = scalar_lea.vmem (!%p1222_p3), [#allocation6], %s1117_s8 }
  0x72   : > { %859 = dma.done.wait (%p1223_p0), %s233_s26, 128  }
  0x73   : > { %861 = vsyncadd (%p1223_p0), %s233_s26, 4294967168  ;;  %s241_s4 = sand.u32 1, %s953_s18   ;;  %s245_s19 = scalar_lea.vmem [#allocation9], %s1117_s8 }
  0x74   : > { %s242_s11 = scalar_lea.sflag [#allocation10], %s241_s4 }
  0x75   : > { %863 = dma.done.wait (%p1223_p0), %s242_s11, 256  }
  0x76   : > { %865 = vsyncadd (%p1223_p0), %s242_s11, 4294967040  ;;  %vm300_vm0 = vcmask 261120   ;;  %v897_v0 = vmov 0.0   ;;  %vm898_vm1 = vmmov 0   ;;  %v303_v1 = vld [vmem:[%s245_s19] sm:$0xff]  ;;  %v292_v2 = vld [vmem:[%s236_s16] sm:$0xff] }
  0x77   : > { %620 = vmatprep.subr.bf16.mxu0 %v897_v0  ;;  %301 = vst.msk [vmem:[#allocation5] sm:$0xff] %vm300_vm0, %v897_v0  ;;  %622 = vmatprep.mubr.msk.bf16.mxu0 %vm898_vm1, %v897_v0  ;;  %v304_v3 = vpack.c.bf16 %v303_v1, %v303_v1  ;;  %v293_v4 = vmul.f32 0.17677669, %v292_v2  ;;  %vm295_vm2 = vcmask 257024   ;;  %vm297_vm3 = vcmask 7168   ;;  %s254_s18 = scalar_lea.vmem [#allocation11], %s1117_s8 }
  0x78   : > { %626 = vmatprep.subr.bf16.mxu1 %v897_v0  ;;  %628 = vmatprep.mubr.msk.bf16.mxu1 %vm898_vm1, %v897_v0  ;;  %v899_v8 = vmov -inf   ;;  %299 = vst.msk [vmem:[#allocation4] sm:$0xff] %vm297_vm3, %v897_v0  ;;  %vm355_vm4 = vcmask 64512   ;;  %v900_v14 = vmov 0   ;;  %v305_v19 = vld [vmem:[%s254_s18] sm:$0xff]  ;;  %vm392_vm5 = vcmask 1043456  }
  0x79   : > { %v312_v5 = vsel %vm300_vm0, %v304_v3, 0  ;;  %v294_v6 = vpack.c.bf16 %v293_v4, %v293_v4  ;;  %298 = vst.msk [vmem:[#allocation3] sm:$0xff] %vm297_vm3, %v899_v8  ;;  %708 = vset.pattern.permute.xlu0 %v900_v14  ;;  %709 = vset.pattern.permute.xlu1 %v900_v14  ;;  %v306_v20 = vpack.c.bf16 %v305_v19, %v305_v19  ;;  %s613_s24 = sshll.u32 %s884_s15, 7  ;;  %s286_s7 = scalar_lea.vmem [#allocation12], %s1117_s8 }
  0x7a   : > { %621 = vmatpush3.bf16.xpose.msra.mxu0 %v312_v5  ;;  %s467_s20 = sshll.u32 %s286_s7, 4  ;;  %s1148_s9 = scalar_lea.hbm %s1201_s3, %s613_s24  ;;  %s1150_s20 = int_to_ptr.vmem [resolvable:$true] %s467_s20 }
  0x7b   : > { %296 = vst.msk [vmem:[#allocation2] sm:$0xf] %vm295_vm2, %v294_v6  ;;  %v394_v21 = vsel %vm392_vm5, %v306_v20, 0  ;;  %s453_s22 = scalar_lea.sflag [#allocation8], %s1114_s21  ;;  %s806_s28 = scalar_lea.vmem %s1150_s20, 128 }
  0x7c   : > { %627 = vmatpush3.bf16.msra.mxu1 %v394_v21  ;;  %p807_p4 = scmp.ne.s32.totalorder %s1150_s20, %s806_s28  ;;  %p1224_p10 = scmp.ne.s32.totalorder %s1212_s25, 0 }
  0x7d   : > { %s901_s15 = smov [#allocation12]  }
  0x7e   : > { %v382_v36 = vld [vmem:[#allocation5] sm:$0xff]  ;;  %p808_p12 = pnand %p807_p4, %p1224_p10  ;;  %s810_s30 = sshll.u32 %s901_s15, 4  ;;  %s811_s30 = int_to_ptr.vmem [resolvable:$false] %s810_s30 }
  0x7f   : > { %v373_v31 = vld [vmem:[#allocation4] sm:$0xff]  ;;  %s812_s1 = scalar_lea.vmem %s811_s30, 256  ;;  %p813_p8 = scmp.lt.s32.totalorder %s1150_s20, %s811_s30 }
  0x80   : > { %v354_v15 = vld [vmem:[#allocation3] sm:$0xff]  ;;  %p809_p1 = pneg %p808_p12  ;;  %p814_p9 = scmp.lt.s32.totalorder %s812_s1, %s806_s28 }
  0x82   : > { %v302_v7 = vld [vmem:[#allocation2] sm:$0xf]  ;;  %p815_p6 = por %p814_p9, %p813_p8 }
  0x83   : > { %623 = vmatmul.mubr.msk.bf16.vlgmr.msra.gmra.mrb[0].mxu0 %vm300_vm0, %v302_v7 }
  0x84   : > { %p816_p13 = pnand %p815_p6, %p809_p1 }
 0x156   : > { %v348_v9 = vpop.f32.mrb[0].mxu0 }
 0x157   : > { %v624_v10 = vpop.f32.mrb[1].mxu0  ;;  %v356_v11 = vsel %vm355_vm4, %v348_v9, -inf }
 0x158   : > { %357 = vmax.xlane.f32.xlu0 %v356_v11  ;;  %v351_v12 = vpop.f32.mrb[2].mxu0 }
 0x159   : > { %v625_v13 = vpop.f32.mrb[3].mxu0 }
 0x1e5   : > { %v358_v16 = vpop.xlane.xlu0 %357 }
 0x1e6   : > { %v359_v17 = vmax.f32 %v354_v15, %v358_v16 }
 0x1e8   : > { %v360_v18 = vsub.f32 %v354_v15, %v359_v17  ;;  %438 = vst.msk [vmem:[#allocation3] sm:$0xff] %vm297_vm3, %v359_v17  ;;  %365 = vperm.xlu0 %708, %v359_v17  }
 0x1ea   : > { %v361_v29 = vmul.f32 1.442695, %v360_v18 }
 0x267   : > { %v366_v22 = vpop.permute.xlu0 %365 }
 0x268   : > { %v368_v23 = vsub.f32 %v348_v9, %v366_v22 }
 0x26a   : > { %v369_v24 = vpack.c.bf16 %v368_v23, %v368_v23 }
 0x26c   : > { %v371_v25 = vmul.bf16 1069105081, %v369_v24 }
 0x26e   : > { %710 = vpow.bf16 %v371_v25 }
 0x26f   : > { %712 = vpow2.f32 %v361_v29 }
 0x279   : > { %v711_v26 = vpop.eup %710 }
 0x27a   : > { %629 = vmatmul.mubr.msk.bf16.vlgmr.msra.gmra.mrb[0].mxu1 %vm355_vm4, %v711_v26  ;;  %v375_v27 = vunpack.c.l.bf16 %v711_v26  ;;  %v713_v30 = vpop.eup %712 }
 0x27b   : > { %v374_v32 = vmul.f32 %v713_v30, %v373_v31 }
 0x27c   : > { %v376_v28 = vsel %vm355_vm4, %v375_v27, 0.0 }
 0x27d   : > { %377 = vadd.xlane.f32.xlu1 %v376_v28 }
 0x28e   : > { %385 = vperm.xlu1 %709, %v713_v30  }
 0x30a   : > { %v378_v33 = vpop.xlane.xlu1 %377 }
 0x30b   : > { %v379_v34 = vadd.f32 %v378_v33, %v374_v32 }
 0x30d   : > { %381 = vst.msk [vmem:[#allocation4] sm:$0xff] %vm297_vm3, %v379_v34 }
 0x30e   : > { %v386_v37 = vpop.permute.xlu1 %385 }
 0x30f   : > { %v388_v38 = vmul.f32 %v386_v37, %v382_v36 }
 0x314   : > { %v443_v35 = vld [vmem:[#allocation4] sm:$0xff] }
 0x315   : > { %446 = vperm.xlu1 %709, %v443_v35  }
 0x34d   : > { %v430_v39 = vpop.f32.mrb[0].mxu1 }
 0x34e   : > { %v436_v40 = vadd.f32 %v430_v39, %v388_v38  ;;  %v630_v41 = vpop.f32.mrb[1].mxu1 }
 0x34f   : > { %v433_v42 = vpop.f32.mrb[2].mxu1 }
 0x350   : > { %437 = vst.msk [vmem:[#allocation5] sm:$0xff] %vm300_vm0, %v436_v40  ;;  %v631_v43 = vpop.f32.mrb[3].mxu1 }
 0x357   : > { %v442_v46 = vld [vmem:[#allocation5] sm:$0xff] }
 0x394   : > { %v447_v44 = vpop.permute.xlu1 %446 }
 0x395   : > { %714 = vrcp.f32 %v447_v44 }
 0x39f   : > { %v715_v45 = vpop.eup %714 }
 0x3a0   : > { %v450_v47 = vmul.f32 %v715_v45, %v442_v46 }
 0x3a2   : > { %451 = vst.msk [vmem:[%s286_s7] sm:$0xff] %vm300_vm0, %v450_v47 }
 0x3a3   : > { %819 = shalt.err (!%p816_p13)
}
 0x3a4   : > { %s820_s29 = scalar_lea.hbm %s1148_s9, 128  ;;  %s824_s21 = scalar_lea.hbm %s1201_s3, 256 }
 0x3a5   : > { %p821_p11 = scmp.ne.s32.totalorder %s1148_s9, %s820_s29  ;;  %p825_p7 = scmp.lt.u32.totalorder %s1148_s9, %s1201_s3 }
 0x3a6   : > { %p826_p3 = scmp.lt.u32.totalorder %s824_s21, %s820_s29  ;;  %p828_p4 = scmp.lt.u32.totalorder %s820_s29, %s1148_s9 }
 0x3a7   : > { %p822_p2 = pnand %p821_p11, %p1224_p10 }
 0x3a8   : > { %p827_p0 = por %p826_p3, %p825_p7 }
 0x3a9   : > { %p823_p5 = pneg %p822_p2 }
 0x3aa   : > { %p829_p12 = por %p828_p4, %p827_p0 }
 0x3ac   : > { %p830_p1 = pnand %p829_p12, %p823_p5 }
 0x3ae   : > { %833 = shalt.err (!%p830_p1)
}
 0x3af   : > { %638 = dma.vmem_to_hbm [thread:$0]  (%p1224_p10), %s1150_s20, 128, %s1148_s9, %s453_s22  }
 0x3b0 PF: > { %s479_s16 = sand.u32 1, %s872_s12   ;;  %p1225_p8 = scmp.ne.s32.totalorder %s1214_s27, 0 }
 0x3b1   : > { %p1226_p9 = scmp.ge.s32.totalorder %s892_s17, 2  ;;  %s480_s4 = scalar_lea.sflag [#allocation8], %s479_s16 }
 0x3b3   : > { %p651_p6 = pnand %p1226_p9, %p1225_p8 }
 0x3b5   : > { %867 = dma.done.wait (!%p651_p6), %s480_s4, 128  }
 0x3b6   : > { %869 = vsyncadd (!%p651_p6), %s480_s4, 4294967168  ;;  %s22_s17 = sadd.s32 1, %s892_s17   ;;  %s1227_s25 = sld [smem:[#allocation18_spill]] }
 0x3b7   : > { %p19_p13 = scmp.ge.s32.totalorder %s22_s17, 4   ;;  %s1228_s15 = sld [smem:[#allocation16_spill]] }
 0x3b8   : > { %s1229_s16 = sld [smem:[#allocation17_spill]]  ;;  %s1230_s12 = smov %s876_s13 }
 0x3b9   : > { %s1231_s13 = smov %s880_s14  ;;  %21 = sbr.rel (!%p19_p13) target bundleno = 10 (0xa), region = 109 }
 0x3bc   : > { %s1232_s14 = smov %s1227_s25 }
 0x3c0   :  { %485 = vsyncpa [#allocation7], 1 }
 0x3c1   :  { %487 = vsyncpa [#allocation7 + $0x1], 1 }
 0x3c2   :  { %488 = vsyncpa [#allocation10], 1 }
 0x3c3   :  { %490 = vsyncpa [#allocation10 + $0x1], 1 }
 0x3c4   :  { %491 = vsyncpa [#allocation8], 1 }
 0x3c5   :  { %493 = vsyncpa [#allocation8 + $0x1], 1 }

</bundles_post_ra>
